<compile_context>
chip_gen: v5e
topology: v5e:2x2
jax: 0.10.0
libtpu: 0.0.40
codegen_flags: <defaults>
</compile_context>

<pallas_src>
import functools

import jax
import jax.numpy as jnp
import numpy as np
from jax import lax
from jax.experimental import pallas as pl
from jax.experimental.pallas import tpu as pltpu


# ----------------------------------------------------------------------------
# Kernel 1: tanh-RNN encoder, T-chunked grid, hoisted input projection,
#           lane-dense (T*B, H) output, recurrent carry in VMEM scratch.
# ----------------------------------------------------------------------------
def rnn_kernel(x_ref, wih_ref, whh_ref, b_ref, out_ref, h_ref, *, chunk, batch):
    # x_ref  : (chunk*batch, Din)  time-major input rows for this T-chunk
    # out_ref: (chunk*batch, H)    hidden states (lane-dense 2-D layout)
    # h_ref  : (batch, H)          recurrent carry, persists across grid steps
    @pl.when(pl.program_id(0) == 0)
    def _():
        h_ref[...] = jnp.zeros_like(h_ref)

    # Hoisted input projection: one MXU GEMM for all `chunk` timesteps; bias is
    # added once (not per step).  Result is staged into the output block, which
    # the recurrence then updates in place.
    out_ref[...] = (
        jnp.dot(x_ref[...], wih_ref[...], preferred_element_type=jnp.float32)
        + b_ref[...])

    whh = whh_ref[...]            # load recurrent weights once, reuse every step
    h = h_ref[...]
    # `chunk` is small and static -> fully unrolled; every slice offset is static
    # and each step is just one (B,H)x(H,H) MXU matmul + tanh (EUP) + store.
    for t in range(chunk):
        rows = pl.ds(t * batch, batch)
        h = jnp.tanh(out_ref[rows, :]
                     + jnp.dot(h, whh, preferred_element_type=jnp.float32))
        out_ref[rows, :] = h
    h_ref[...] = h


def rnn_encode(x_tbd, w_ih, w_hh, b, *, t_chunk=8):
    """x_tbd: time-major (T, B, Din) -> batch-major hidden states (B, T, H)."""
    T, B, Din = x_tbd.shape
    H = w_hh.shape[0]
    # Timesteps streamed per grid step (auto double-buffered).  The block's
    # sublane extent (chunk*B) must be a multiple of 8, otherwise fall back to
    # the whole sequence in one block.
    chunk = t_chunk if (T % t_chunk == 0 and (t_chunk * B) % 8 == 0) else T
    x2d = x_tbd.reshape(T * B, Din)        # free: row-major merge of (T, B)
    out = pl.pallas_call(
        functools.partial(rnn_kernel, chunk=chunk, batch=B),
        out_shape=jax.ShapeDtypeStruct((T * B, H), jnp.float32),
        grid=(T // chunk,),
        in_specs=[
            pl.BlockSpec((chunk * B, Din), lambda i: (i, 0)),   # streamed input
            pl.BlockSpec((Din, H), lambda i: (0, 0)),           # W_ih
            pl.BlockSpec((H, H), lambda i: (0, 0)),             # W_hh
            pl.BlockSpec((1, H), lambda i: (0, 0)),             # bias
        ],
        out_specs=pl.BlockSpec((chunk * B, H), lambda i: (i, 0)),
        scratch_shapes=[pltpu.VMEM((B, H), jnp.float32)],       # recurrent carry
        compiler_params=pltpu.CompilerParams(
            dimension_semantics=("arbitrary",)),                # sequential carry
    )(x2d, w_ih, w_hh, b)
    return out.reshape(T, B, H).transpose(1, 0, 2)


# ----------------------------------------------------------------------------
# Kernel 2: question attention pooling + bilinear start/end scores + CE loss.
#           Grid over batch ("parallel"); all contractions are MXU matmuls;
#           lengths / positions / biases in SMEM.
# ----------------------------------------------------------------------------
def score_loss_kernel(q_hid_ref, p_ref, e_hid_ref, ws_ref, we_ref,
                      qlen_ref, elen_ref, spos_ref, epos_ref, bias_ref,
                      loss_ref, start_ref, end_ref):
    b = pl.program_id(0)
    q_hid = q_hid_ref[...]                                   # (1, Tq, H)
    e_hid = e_hid_ref[...]                                   # (1, Te, H)
    Tq = q_hid.shape[1]
    Te = e_hid.shape[1]

    # --- DotWordSeqAttention: logits via batched MXU matmul, masked softmax ---
    att = jnp.einsum('bqh,bth->bqt', p_ref[...], q_hid,
                     preferred_element_type=jnp.float32)     # (1, 1, Tq)
    tq_idx = lax.broadcasted_iota(jnp.int32, (1, 1, Tq), 2)
    att = jnp.where(tq_idx < qlen_ref[b], att, -1e30)
    att = att - jnp.max(att, axis=2, keepdims=True)
    w = jnp.exp(att)
    w = w * pl.reciprocal(jnp.sum(w, axis=2, keepdims=True), approx=True)
    q_emb = jnp.einsum('bqt,bth->bqh', w, q_hid,
                       preferred_element_type=jnp.float32)   # (1, 1, H)

    # --- Bilinear matchers: score[t] = e[t] . (W q) + bias, then * e_mask -----
    te_idx = lax.broadcasted_iota(jnp.int32, (1, 1, Te), 2)
    e_mask = (te_idx < elen_ref[b]).astype(jnp.float32)

    def bilinear(w_ref, bias):
        # r[0,0,i] = sum_k W[i,k] * q_emb[0,0,k]   (MXU)
        r = jnp.einsum('bqk,bik->bqi', q_emb, w_ref[...],
                       preferred_element_type=jnp.float32)   # (1, 1, H)
        s = jnp.einsum('bqh,bth->bqt', r, e_hid,
                       preferred_element_type=jnp.float32)   # (1, 1, Te)
        return (s + bias) * e_mask

    start_score = bilinear(ws_ref, bias_ref[0])
    end_score = bilinear(we_ref, bias_ref[1])

    # --- per-sample CrossEntropy pieces (mean over batch taken in the wrapper) -
    def ce(score, pos):
        m = jnp.max(score, axis=2, keepdims=True)
        lse = m + jnp.log(jnp.sum(jnp.exp(score - m), axis=2, keepdims=True))
        right = jnp.sum(jnp.where(te_idx == pos, score, 0.0),
                        axis=2, keepdims=True)
        return lse - right                                   # (1, 1, 1)

    loss_ref[...] = ce(start_score, spos_ref[b]) + ce(end_score, epos_ref[b])
    start_ref[...] = start_score
    end_ref[...] = end_score


def score_and_loss(q_hid, p, q_lens, e_hid, w_s, b_s, w_e, b_e,
                   e_lens, start_pos, end_pos):
    B, Tq, H = q_hid.shape
    Te = e_hid.shape[1]
    smem = pl.BlockSpec(memory_space=pltpu.MemorySpace.SMEM)
    loss_parts, start, end = pl.pallas_call(
        score_loss_kernel,
        out_shape=(jax.ShapeDtypeStruct((B, 1, 1), jnp.float32),
                   jax.ShapeDtypeStruct((B, 1, Te), jnp.float32),
                   jax.ShapeDtypeStruct((B, 1, Te), jnp.float32)),
        grid=(B,),
        in_specs=[
            pl.BlockSpec((1, Tq, H), lambda b: (b, 0, 0)),   # question hiddens
            pl.BlockSpec((1, 1, H), lambda b: (0, 0, 0)),    # attention vector
            pl.BlockSpec((1, Te, H), lambda b: (b, 0, 0)),   # evidence hiddens
            pl.BlockSpec((1, H, H), lambda b: (0, 0, 0)),    # W_start
            pl.BlockSpec((1, H, H), lambda b: (0, 0, 0)),    # W_end
            smem, smem, smem, smem, smem,                    # lens / pos / biases
        ],
        out_specs=(pl.BlockSpec((1, 1, 1), lambda b: (b, 0, 0)),
                   pl.BlockSpec((1, 1, Te), lambda b: (b, 0, 0)),
                   pl.BlockSpec((1, 1, Te), lambda b: (b, 0, 0))),
        compiler_params=pltpu.CompilerParams(
            dimension_semantics=("parallel",)),              # megacore over batch
    )(q_hid, p.reshape(1, 1, H), e_hid,
      w_s.reshape(1, H, H), w_e.reshape(1, H, H),
      q_lens.astype(jnp.int32), e_lens.astype(jnp.int32),
      start_pos.astype(jnp.int32), end_pos.astype(jnp.int32),
      jnp.stack([b_s, b_e]).astype(jnp.float32))
    loss = jnp.mean(loss_parts)          # = CE(start).mean + CE(end).mean
    return loss, start[:, 0, :], end[:, 0, :]


# ----------------------------------------------------------------------------
# Glue: embedding lookup (time-major so only int32 ids get transposed) + forward
# ----------------------------------------------------------------------------
def embed_time_major(word_ids, feat_ids, word_tbl, feat_tbl):
    w = jnp.take(word_tbl, word_ids.T, axis=0)               # (T, B, word_vec)
    f = jnp.take(feat_tbl, feat_ids[..., 0].T, axis=0)       # (T, B, feat_dim)
    return jnp.concatenate([w, f], axis=-1)


def document_reader_qa_loss(params, batch):
    # Question path.
    q_in = embed_time_major(batch["q_text"], batch["q_feat_ids"],
                            params["word_tbl"], params["feat_tbl"])
    q_hid = rnn_encode(q_in, params["wih_q"], params["whh_q"], params["b_q"])

    # Evidence path (embedding + 10 raw features).
    e_emb = embed_time_major(batch["e_text"], batch["e_feat_ids"],
                             params["word_tbl"], params["feat_tbl"])
    e_in = jnp.concatenate(
        [e_emb, jnp.transpose(batch["e_feature"], (1, 0, 2))], axis=-1)
    e_hid = rnn_encode(e_in, params["wih_e"], params["whh_e"], params["b_e"])

    return score_and_loss(
        q_hid, params["attn_p"], batch["q_lens"], e_hid,
        params["w_start"], params["b_start"], params["w_end"], params["b_end"],
        batch["e_lens"], batch["start_position"], batch["end_position"])


# ----------------------------------------------------------------------------
# Pure-JAX reference for correctness check
# ----------------------------------------------------------------------------
def _embed_ref(word_ids, feat_ids, word_tbl, feat_tbl):
    w = jnp.take(word_tbl, word_ids, axis=0)
    f = jnp.take(feat_tbl, feat_ids[..., 0], axis=0)
    return jnp.concatenate([w, f], axis=-1)


def _rnn_ref(x_btd, w_ih, w_hh, b):
    def step(h, xt):
        h = jnp.tanh(xt @ w_ih + h @ w_hh + b)
        return h, h
    B = x_btd.shape[0]
    H = w_hh.shape[0]
    _, hs = lax.scan(step, jnp.zeros((B, H), jnp.float32),
                     jnp.transpose(x_btd, (1, 0, 2)))
    return jnp.transpose(hs, (1, 0, 2))


def reference_loss(params, batch):
    q_in = _embed_ref(batch["q_text"], batch["q_feat_ids"],
                      params["word_tbl"], params["feat_tbl"])
    q_hid = _rnn_ref(q_in, params["wih_q"], params["whh_q"], params["b_q"])
    e_emb = _embed_ref(batch["e_text"], batch["e_feat_ids"],
                       params["word_tbl"], params["feat_tbl"])
    e_in = jnp.concatenate([e_emb, batch["e_feature"]], axis=-1)
    e_hid = _rnn_ref(e_in, params["wih_e"], params["whh_e"], params["b_e"])

    B, Tq, H = q_hid.shape
    Te = e_hid.shape[1]
    att = jnp.einsum("bth,h->bt", q_hid, params["attn_p"])
    q_mask = jnp.arange(Tq)[None, :] < batch["q_lens"][:, None]
    att = jnp.where(q_mask, att, -1e30)
    w = jax.nn.softmax(att, axis=1)
    q_emb = jnp.einsum("bt,bth->bh", w, q_hid)

    e_mask = (jnp.arange(Te)[None, :] < batch["e_lens"][:, None]).astype(jnp.float32)

    def bil(W, b):
        return (jnp.einsum("bth,hk,bk->bt", e_hid, W, q_emb) + b) * e_mask

    s_score = bil(params["w_start"], params["b_start"])
    e_score = bil(params["w_end"], params["b_end"])

    def ce(score, pos):
        lse = jax.scipy.special.logsumexp(score, axis=1)
        right = jnp.take_along_axis(score, pos[:, None], axis=1)[:, 0]
        return jnp.mean(lse - right)

    loss = ce(s_score, batch["start_position"]) + ce(e_score, batch["end_position"])
    return loss, s_score, e_score


# ----------------------------------------------------------------------------
if __name__ == "__main__":
    key = jax.random.PRNGKey(0)
    ks = jax.random.split(key, 16)

    B, Tq, Te = 2, 8, 16
    vocab, feat_vocab = 100, 7
    word_vec, feat_dim, H = 24, 8, 32
    D_emb = word_vec + feat_dim          # Embeddings.output_size
    D_evid = D_emb + 10                  # evidence encoder input size (+10 raw feats)

    params = {
        "word_tbl": 0.1 * jax.random.normal(ks[0], (vocab, word_vec), jnp.float32),
        "feat_tbl": 0.1 * jax.random.normal(ks[1], (feat_vocab, feat_dim), jnp.float32),
        "attn_p": jax.random.normal(ks[2], (H,), jnp.float32),   # ~N(0,1) as in reset_parameters
        "wih_q": 0.1 * jax.random.normal(ks[3], (D_emb, H), jnp.float32),
        "whh_q": 0.1 * jax.random.normal(ks[4], (H, H), jnp.float32),
        "b_q": jnp.zeros((1, H), jnp.float32),
        "wih_e": 0.1 * jax.random.normal(ks[5], (D_evid, H), jnp.float32),
        "whh_e": 0.1 * jax.random.normal(ks[6], (H, H), jnp.float32),
        "b_e": jnp.zeros((1, H), jnp.float32),
        "w_start": 0.1 * jax.random.normal(ks[7], (H, H), jnp.float32),
        "b_start": jnp.float32(0.01),
        "w_end": 0.1 * jax.random.normal(ks[8], (H, H), jnp.float32),
        "b_end": jnp.float32(-0.01),
    }

    batch = {
        "q_text": jax.random.randint(ks[9], (B, Tq), 0, vocab, jnp.int32),
        "q_feat_ids": jax.random.randint(ks[10], (B, Tq, 1), 0, feat_vocab, jnp.int32),
        "q_lens": jnp.array([8, 5], jnp.int32),
        "e_text": jax.random.randint(ks[11], (B, Te), 0, vocab, jnp.int32),
        "e_feat_ids": jax.random.randint(ks[12], (B, Te, 1), 0, feat_vocab, jnp.int32),
        "e_feature": jax.random.normal(ks[13], (B, Te, 10), jnp.float32),
        "e_lens": jnp.array([16, 12], jnp.int32),
        "start_position": jnp.array([3, 1], jnp.int32),
        "end_position": jnp.array([6, 4], jnp.int32),
    }

    loss, start_score, end_score = document_reader_qa_loss(params, batch)
    jax.block_until_ready((loss, start_score, end_score))

    ref_loss, ref_s, ref_e = reference_loss(params, batch)
    assert np.allclose(np.asarray(loss), np.asarray(ref_loss), rtol=1e-3, atol=1e-3), (
        float(loss), float(ref_loss))
    assert np.allclose(np.asarray(start_score), np.asarray(ref_s), rtol=1e-3, atol=1e-3)
    assert np.allclose(np.asarray(end_score), np.asarray(ref_e), rtol=1e-3, atol=1e-3)

    print("KERNEL_OK")
</pallas_src>

<mosaic_0001>
module attributes {stable_mosaic.version = 11 : i64} {
  func.func @rnn_kernel(%arg0: i32, %arg1: memref<16x32xf32, #tpu.memory_space<vmem>>, %arg2: memref<32x32xf32, #tpu.memory_space<vmem>>, %arg3: memref<32x32xf32, #tpu.memory_space<vmem>>, %arg4: memref<1x32xf32, #tpu.memory_space<vmem>>, %arg5: memref<16x32xf32, #tpu.memory_space<vmem>>, %arg6: memref<2x32xf32, #tpu.memory_space<vmem>>) attributes {dimension_semantics = [#tpu.dimension_semantics<arbitrary>], iteration_bounds = array<i64: 1>, scalar_prefetch = 0 : i64, scratch_operands = 1 : i64, tpu.core_type = #tpu.core_type<tc>, window_params = [{transform_indices = @transform_0, window_bounds = array<i64: 16, 32>}, {pipeline_mode = #tpu.pipeline_mode<synchronous>, transform_indices = @transform_1, window_bounds = array<i64: 32, 32>}, {pipeline_mode = #tpu.pipeline_mode<synchronous>, transform_indices = @transform_2, window_bounds = array<i64: 32, 32>}, {pipeline_mode = #tpu.pipeline_mode<synchronous>, transform_indices = @transform_3, window_bounds = array<i64: 1, 32>}, {transform_indices = @transform_4, window_bounds = array<i64: 16, 32>}]} {
    %c0_i32 = arith.constant 0 : i32
    %0 = arith.cmpi eq, %arg0, %c0_i32 : i32
    %1 = arith.extui %0 : i1 to i32
    %c0_i32_0 = arith.constant 0 : i32
    %2 = arith.cmpi ne, %1, %c0_i32_0 : i32
    scf.if %2 {
      %cst_47 = arith.constant 0.000000e+00 : f32
      %53 = vector.broadcast %cst_47 : f32 to vector<2x32xf32>
      %c0_48 = arith.constant 0 : index
      %c0_49 = arith.constant 0 : index
      %54 = vector.load %arg6[%c0_48, %c0_49] : memref<2x32xf32, #tpu.memory_space<vmem>>, vector<2x32xf32>
      tpu.vector_store %arg6[%c0_48, %c0_49], %53 {strides = array<i32>} : memref<2x32xf32, #tpu.memory_space<vmem>>, vector<2x32xf32>,
    } else {
    }
    %c0 = arith.constant 0 : index
    %c0_1 = arith.constant 0 : index
    %3 = vector.load %arg1[%c0, %c0_1] : memref<16x32xf32, #tpu.memory_space<vmem>>, vector<16x32xf32>
    %c0_2 = arith.constant 0 : index
    %c0_3 = arith.constant 0 : index
    %4 = vector.load %arg2[%c0_2, %c0_3] : memref<32x32xf32, #tpu.memory_space<vmem>>, vector<32x32xf32>
    %cst = arith.constant dense<0.000000e+00> : vector<16x32xf32>
    %5 = tpu.matmul %3, %4, %cst {dimension_numbers = #tpu.dot_dimension_numbers<[1], [0], [0], [1], [0, 0, 1, 1], [], []>} : vector<16x32xf32>, vector<32x32xf32>, vector<16x32xf32> -> vector<16x32xf32>
    %c0_4 = arith.constant 0 : index
    %c0_5 = arith.constant 0 : index
    %6 = vector.load %arg4[%c0_4, %c0_5] : memref<1x32xf32, #tpu.memory_space<vmem>>, vector<1x32xf32>
    %7 = vector.broadcast %6 : vector<1x32xf32> to vector<16x32xf32>
    %8 = arith.addf %5, %7 : vector<16x32xf32>
    %c0_6 = arith.constant 0 : index
    %c0_7 = arith.constant 0 : index
    %9 = vector.load %arg5[%c0_6, %c0_7] : memref<16x32xf32, #tpu.memory_space<vmem>>, vector<16x32xf32>
    tpu.vector_store %arg5[%c0_6, %c0_7], %8 {strides = array<i32>} : memref<16x32xf32, #tpu.memory_space<vmem>>, vector<16x32xf32>,
    %c0_8 = arith.constant 0 : index
    %c0_9 = arith.constant 0 : index
    %10 = vector.load %arg3[%c0_8, %c0_9] : memref<32x32xf32, #tpu.memory_space<vmem>>, vector<32x32xf32>
    %c0_10 = arith.constant 0 : index
    %c0_11 = arith.constant 0 : index
    %11 = vector.load %arg6[%c0_10, %c0_11] : memref<2x32xf32, #tpu.memory_space<vmem>>, vector<2x32xf32>
    %c0_12 = arith.constant 0 : index
    %c0_13 = arith.constant 0 : index
    %12 = vector.load %arg5[%c0_12, %c0_13] : memref<16x32xf32, #tpu.memory_space<vmem>>, vector<2x32xf32>
    %cst_14 = arith.constant dense<0.000000e+00> : vector<2x32xf32>
    %13 = tpu.matmul %11, %10, %cst_14 {dimension_numbers = #tpu.dot_dimension_numbers<[1], [0], [0], [1], [0, 0, 1, 1], [], []>} : vector<2x32xf32>, vector<32x32xf32>, vector<2x32xf32> -> vector<2x32xf32>
    %14 = arith.addf %12, %13 : vector<2x32xf32>
    %15 = math.tanh %14 : vector<2x32xf32>
    %c0_15 = arith.constant 0 : index
    %c0_16 = arith.constant 0 : index
    %16 = vector.load %arg5[%c0_15, %c0_16] : memref<16x32xf32, #tpu.memory_space<vmem>>, vector<2x32xf32>
    tpu.vector_store %arg5[%c0_15, %c0_16], %15 {strides = array<i32>} : memref<16x32xf32, #tpu.memory_space<vmem>>, vector<2x32xf32>,
    %c2 = arith.constant 2 : index
    %c0_17 = arith.constant 0 : index
    %17 = vector.load %arg5[%c2, %c0_17] : memref<16x32xf32, #tpu.memory_space<vmem>>, vector<2x32xf32>
    %cst_18 = arith.constant dense<0.000000e+00> : vector<2x32xf32>
    %18 = tpu.matmul %15, %10, %cst_18 {dimension_numbers = #tpu.dot_dimension_numbers<[1], [0], [0], [1], [0, 0, 1, 1], [], []>} : vector<2x32xf32>, vector<32x32xf32>, vector<2x32xf32> -> vector<2x32xf32>
    %19 = arith.addf %17, %18 : vector<2x32xf32>
    %20 = math.tanh %19 : vector<2x32xf32>
    %c2_19 = arith.constant 2 : index
    %c0_20 = arith.constant 0 : index
    %21 = vector.load %arg5[%c2_19, %c0_20] : memref<16x32xf32, #tpu.memory_space<vmem>>, vector<2x32xf32>
    tpu.vector_store %arg5[%c2_19, %c0_20], %20 {strides = array<i32>} : memref<16x32xf32, #tpu.memory_space<vmem>>, vector<2x32xf32>,
    %c4 = arith.constant 4 : index
    %c0_21 = arith.constant 0 : index
    %22 = vector.load %arg5[%c4, %c0_21] : memref<16x32xf32, #tpu.memory_space<vmem>>, vector<2x32xf32>
    %cst_22 = arith.constant dense<0.000000e+00> : vector<2x32xf32>
    %23 = tpu.matmul %20, %10, %cst_22 {dimension_numbers = #tpu.dot_dimension_numbers<[1], [0], [0], [1], [0, 0, 1, 1], [], []>} : vector<2x32xf32>, vector<32x32xf32>, vector<2x32xf32> -> vector<2x32xf32>
    %24 = arith.addf %22, %23 : vector<2x32xf32>
    %25 = math.tanh %24 : vector<2x32xf32>
    %c4_23 = arith.constant 4 : index
    %c0_24 = arith.constant 0 : index
    %26 = vector.load %arg5[%c4_23, %c0_24] : memref<16x32xf32, #tpu.memory_space<vmem>>, vector<2x32xf32>
    tpu.vector_store %arg5[%c4_23, %c0_24], %25 {strides = array<i32>} : memref<16x32xf32, #tpu.memory_space<vmem>>, vector<2x32xf32>,
    %c6 = arith.constant 6 : index
    %c0_25 = arith.constant 0 : index
    %27 = vector.load %arg5[%c6, %c0_25] : memref<16x32xf32, #tpu.memory_space<vmem>>, vector<2x32xf32>
    %cst_26 = arith.constant dense<0.000000e+00> : vector<2x32xf32>
    %28 = tpu.matmul %25, %10, %cst_26 {dimension_numbers = #tpu.dot_dimension_numbers<[1], [0], [0], [1], [0, 0, 1, 1], [], []>} : vector<2x32xf32>, vector<32x32xf32>, vector<2x32xf32> -> vector<2x32xf32>
    %29 = arith.addf %27, %28 : vector<2x32xf32>
    %30 = math.tanh %29 : vector<2x32xf32>
    %c6_27 = arith.constant 6 : index
    %c0_28 = arith.constant 0 : index
    %31 = vector.load %arg5[%c6_27, %c0_28] : memref<16x32xf32, #tpu.memory_space<vmem>>, vector<2x32xf32>
    tpu.vector_store %arg5[%c6_27, %c0_28], %30 {strides = array<i32>} : memref<16x32xf32, #tpu.memory_space<vmem>>, vector<2x32xf32>,
    %c8 = arith.constant 8 : index
    %c0_29 = arith.constant 0 : index
    %32 = vector.load %arg5[%c8, %c0_29] : memref<16x32xf32, #tpu.memory_space<vmem>>, vector<2x32xf32>
    %cst_30 = arith.constant dense<0.000000e+00> : vector<2x32xf32>
    %33 = tpu.matmul %30, %10, %cst_30 {dimension_numbers = #tpu.dot_dimension_numbers<[1], [0], [0], [1], [0, 0, 1, 1], [], []>} : vector<2x32xf32>, vector<32x32xf32>, vector<2x32xf32> -> vector<2x32xf32>
    %34 = arith.addf %32, %33 : vector<2x32xf32>
    %35 = math.tanh %34 : vector<2x32xf32>
    %c8_31 = arith.constant 8 : index
    %c0_32 = arith.constant 0 : index
    %36 = vector.load %arg5[%c8_31, %c0_32] : memref<16x32xf32, #tpu.memory_space<vmem>>, vector<2x32xf32>
    tpu.vector_store %arg5[%c8_31, %c0_32], %35 {strides = array<i32>} : memref<16x32xf32, #tpu.memory_space<vmem>>, vector<2x32xf32>,
    %c10 = arith.constant 10 : index
    %c0_33 = arith.constant 0 : index
    %37 = vector.load %arg5[%c10, %c0_33] : memref<16x32xf32, #tpu.memory_space<vmem>>, vector<2x32xf32>
    %cst_34 = arith.constant dense<0.000000e+00> : vector<2x32xf32>
    %38 = tpu.matmul %35, %10, %cst_34 {dimension_numbers = #tpu.dot_dimension_numbers<[1], [0], [0], [1], [0, 0, 1, 1], [], []>} : vector<2x32xf32>, vector<32x32xf32>, vector<2x32xf32> -> vector<2x32xf32>
    %39 = arith.addf %37, %38 : vector<2x32xf32>
    %40 = math.tanh %39 : vector<2x32xf32>
    %c10_35 = arith.constant 10 : index
    %c0_36 = arith.constant 0 : index
    %41 = vector.load %arg5[%c10_35, %c0_36] : memref<16x32xf32, #tpu.memory_space<vmem>>, vector<2x32xf32>
    tpu.vector_store %arg5[%c10_35, %c0_36], %40 {strides = array<i32>} : memref<16x32xf32, #tpu.memory_space<vmem>>, vector<2x32xf32>,
    %c12 = arith.constant 12 : index
    %c0_37 = arith.constant 0 : index
    %42 = vector.load %arg5[%c12, %c0_37] : memref<16x32xf32, #tpu.memory_space<vmem>>, vector<2x32xf32>
    %cst_38 = arith.constant dense<0.000000e+00> : vector<2x32xf32>
    %43 = tpu.matmul %40, %10, %cst_38 {dimension_numbers = #tpu.dot_dimension_numbers<[1], [0], [0], [1], [0, 0, 1, 1], [], []>} : vector<2x32xf32>, vector<32x32xf32>, vector<2x32xf32> -> vector<2x32xf32>
    %44 = arith.addf %42, %43 : vector<2x32xf32>
    %45 = math.tanh %44 : vector<2x32xf32>
    %c12_39 = arith.constant 12 : index
    %c0_40 = arith.constant 0 : index
    %46 = vector.load %arg5[%c12_39, %c0_40] : memref<16x32xf32, #tpu.memory_space<vmem>>, vector<2x32xf32>
    tpu.vector_store %arg5[%c12_39, %c0_40], %45 {strides = array<i32>} : memref<16x32xf32, #tpu.memory_space<vmem>>, vector<2x32xf32>,
    %c14 = arith.constant 14 : index
    %c0_41 = arith.constant 0 : index
    %47 = vector.load %arg5[%c14, %c0_41] : memref<16x32xf32, #tpu.memory_space<vmem>>, vector<2x32xf32>
    %cst_42 = arith.constant dense<0.000000e+00> : vector<2x32xf32>
    %48 = tpu.matmul %45, %10, %cst_42 {dimension_numbers = #tpu.dot_dimension_numbers<[1], [0], [0], [1], [0, 0, 1, 1], [], []>} : vector<2x32xf32>, vector<32x32xf32>, vector<2x32xf32> -> vector<2x32xf32>
    %49 = arith.addf %47, %48 : vector<2x32xf32>
    %50 = math.tanh %49 : vector<2x32xf32>
    %c14_43 = arith.constant 14 : index
    %c0_44 = arith.constant 0 : index
    %51 = vector.load %arg5[%c14_43, %c0_44] : memref<16x32xf32, #tpu.memory_space<vmem>>, vector<2x32xf32>
    tpu.vector_store %arg5[%c14_43, %c0_44], %50 {strides = array<i32>} : memref<16x32xf32, #tpu.memory_space<vmem>>, vector<2x32xf32>,
    %c0_45 = arith.constant 0 : index
    %c0_46 = arith.constant 0 : index
    %52 = vector.load %arg6[%c0_45, %c0_46] : memref<2x32xf32, #tpu.memory_space<vmem>>, vector<2x32xf32>
    tpu.vector_store %arg6[%c0_45, %c0_46], %50 {strides = array<i32>} : memref<2x32xf32, #tpu.memory_space<vmem>>, vector<2x32xf32>,
    return
  }
  func.func @transform_0(%arg0: i32) -> (i32, i32) {
    %c0_i32 = arith.constant 0 : i32
    %c0_i32_0 = arith.constant 0 : i32
    return %arg0, %c0_i32 : i32, i32
  }
  func.func @transform_1(%arg0: i32) -> (i32, i32) {
    %c0_i32 = arith.constant 0 : i32
    %c0_i32_0 = arith.constant 0 : i32
    %c0_i32_1 = arith.constant 0 : i32
    return %c0_i32, %c0_i32_0 : i32, i32
  }
  func.func @transform_2(%arg0: i32) -> (i32, i32) {
    %c0_i32 = arith.constant 0 : i32
    %c0_i32_0 = arith.constant 0 : i32
    %c0_i32_1 = arith.constant 0 : i32
    return %c0_i32, %c0_i32_0 : i32, i32
  }
  func.func @transform_3(%arg0: i32) -> (i32, i32) {
    %c0_i32 = arith.constant 0 : i32
    %c0_i32_0 = arith.constant 0 : i32
    %c0_i32_1 = arith.constant 0 : i32
    return %c0_i32, %c0_i32_0 : i32, i32
  }
  func.func @transform_4(%arg0: i32) -> (i32, i32) {
    %c0_i32 = arith.constant 0 : i32
    %c0_i32_0 = arith.constant 0 : i32
    return %arg0, %c0_i32 : i32, i32
  }
}

</mosaic_0001>

<bundles_post_ra>
// kernel: tpu_custom_call.1
= control target key start
LH: loop header
LB: loop body
LE: loop exit
PB: predicated region body
PF: predicated region fallthrough
CT: control target
= control target key end

     0   :  { %9 = vsyncpa [#allocation4], 0  ;;  %s573_s0 = inlined_call_operand.hbm [shape: f32[16,32], index: 0, kind: input, shape index: {}]   ;;  %s574_s1 = inlined_call_operand.hbm [shape: f32[32,32], index: 1, kind: input, shape index: {}]   ;;  %s575_s2 = inlined_call_operand.hbm [shape: f32[32,32], index: 2, kind: input, shape index: {}]   ;;  %s576_s3 = inlined_call_operand.vmem [shape: f32[1,32], index: 3, kind: input, shape index: {}]   ;;  %s577_s4 = inlined_call_operand.hbm [shape: f32[16,32], index: 4, kind: output, shape index: {}]  }
   0x1   :  { %10 = vsyncpa [#allocation7], 0 }
   0x2   :  { %11 = vsyncpa [#allocation5], 0  ;;  %s29_s17 = sshll.u32 %s574_s1, 4  ;;  %s492_s18 = smov [#allocation6]   ;;  %s30_s17 = int_to_ptr.hbm [resolvable:$true] %s29_s17 }
   0x3   :  { %s31_s19 = sshll.u32 %s492_s18, 4  ;;  %s16_s22 = sshll.u32 %s573_s0, 4  ;;  %s32_s19 = int_to_ptr.vmem [resolvable:$true] %s31_s19  ;;  %s17_s22 = int_to_ptr.hbm [resolvable:$true] %s16_s22 }
   0x4   :  { %s493_s23 = smov 128   ;;  %s494_s24 = smov 8  }
   0x5   :  { %37 = dma.hbm_to_vmem [thread:$0]  %s30_s17, 512, %s32_s19, [#allocation7], %s493_s23, %s493_s23, %s494_s24  }
   0x6   :  { %s495_s25 = smov [#allocation3]   ;;  %s42_s1 = sshll.u32 %s575_s2, 4  ;;  %s43_s1 = int_to_ptr.hbm [resolvable:$true] %s42_s1 }
   0x7   :  { %s18_s26 = sshll.u32 %s495_s25, 4  ;;  %s496_s0 = smov [#allocation8]   ;;  %s19_s26 = int_to_ptr.vmem [resolvable:$true] %s18_s26 }
   0x8   :  { %24 = dma.hbm_to_vmem [thread:$0]  %s17_s22, 256, %s19_s26, [#allocation4], %s493_s23, %s493_s23, %s494_s24  }
   0x9   :  { %s44_s29 = sshll.u32 %s496_s0, 4  ;;  %s45_s29 = int_to_ptr.vmem [resolvable:$true] %s44_s29 }
   0xa   :  { %50 = dma.hbm_to_vmem [thread:$0]  %s43_s1, 512, %s45_s29, [#allocation7], %s493_s23, %s493_s23, %s494_s24  }
   0xb   :  { %486 = dma.done.wait [#allocation4], 256  }
   0xc   :  { %487 = vsyncadd [#allocation4], 4294967040 }
   0xd   :  { %488 = dma.done.wait [#allocation7], 1024  }
   0xe   :  { %489 = vsyncadd [#allocation7], 4294966272  ;;  %vm69_vm0 = vcmask 254976   ;;  %v497_v0 = vmov 0.0   ;;  %v76_v1 = vld [vmem:[#allocation6 + $0x18] sm:$0xff]  ;;  %v75_v2 = vld [vmem:[#allocation6 + $0x10] sm:$0xff] }
   0xf   :  { %70 = vst.msk [vmem:[#allocation2] sm:$0x3] %vm69_vm0, %v497_v0  ;;  %100 = vmatpush.msra.mxu0 %v76_v1  ;;  %v116_v3 = vld [vmem:[#allocation8 + $0x18] sm:$0xff]  ;;  %v74_v4 = vld [vmem:[#allocation6 + $0x8] sm:$0xff]  ;;  %v115_v5 = vld [vmem:[#allocation8 + $0x10] sm:$0xff]  ;;  %vm81_vm1 = vcmask 261120  }
  0x10   :  { %134 = vmatpush.msra.mxu1 %v116_v3  ;;  %162 = vmatpush.msra.mxu2 %v116_v3  ;;  %v114_v6 = vld [vmem:[#allocation8 + $0x8] sm:$0xff]  ;;  %v73_v7 = vld [vmem:[#allocation6] sm:$0xff]  ;;  %v71_v8 = vld [vmem:[#allocation3] sm:$0xff]  ;;  %s342_s8 = sshll.u32 %s577_s4, 4  ;;  %s343_s8 = int_to_ptr.hbm [resolvable:$true] %s342_s8 }
  0x11   :  { %101 = vmatpush.msra.mxu0 %v75_v2  ;;  %189 = vmatpush.msra.mxu3 %v116_v3  ;;  %v113_v9 = vld [vmem:[#allocation8] sm:$0xff]  ;;  %v373_v11 = vld [vmem:[%s576_s3] ss:$0 sm:$0xff]  ;;  %v72_v26 = vld [vmem:[#allocation3 + $0x8] sm:$0xff]  ;;  %s498_s3 = smov [#allocation9]  }
  0x12   :  { %135 = vmatpush.msra.mxu1 %v115_v5  ;;  %163 = vmatpush.msra.mxu2 %v115_v5  ;;  %s340_s5 = sshll.u32 %s498_s3, 4  ;;  %s341_s5 = int_to_ptr.vmem [resolvable:$true] %s340_s5 }
  0x13   :  { %102 = vmatpush.msra.mxu0 %v74_v4  ;;  %190 = vmatpush.msra.mxu3 %v115_v5 }
  0x14   :  { %136 = vmatpush.msra.mxu1 %v114_v6  ;;  %164 = vmatpush.msra.mxu2 %v114_v6 }
  0x15   :  { %103 = vmatpush.msra.mxu0 %v73_v7  ;;  %191 = vmatpush.msra.mxu3 %v114_v6 }
  0x16   :  { %v117_v10 = vld [vmem:[#allocation2] sm:$0x3]  ;;  %356 = vmatmul.msk.f32.vlgmr.msra.gmra.mxu0 %vm81_vm1, %v71_v8  ;;  %137 = vmatpush.msra.mxu1 %v113_v9 }
  0x17   :  { %358 = vmatmul.msk.f32.vlgmr.msra.gmra.mxu1 %vm81_vm1, %v117_v10  ;;  %165 = vmatpush.msra.mxu2 %v113_v9 }
  0x18   :  { %192 = vmatpush.msra.mxu3 %v113_v9  ;;  %216 = vmatpush.msrb.mxu1 %v116_v3 }
  0x19   :  { %243 = vmatpush.msrb.mxu2 %v116_v3  ;;  %297 = vmatpush.msrb.mxu0 %v116_v3 }
  0x1a   :  { %270 = vmatpush.msrb.mxu3 %v116_v3  ;;  %217 = vmatpush.msrb.mxu1 %v115_v5 }
  0x1b   :  { %244 = vmatpush.msrb.mxu2 %v115_v5  ;;  %298 = vmatpush.msrb.mxu0 %v115_v5 }
  0x1c   :  { %271 = vmatpush.msrb.mxu3 %v115_v5  ;;  %218 = vmatpush.msrb.mxu1 %v114_v6 }
  0x1d   :  { %245 = vmatpush.msrb.mxu2 %v114_v6  ;;  %299 = vmatpush.msrb.mxu0 %v114_v6 }
  0x1e   :  { %272 = vmatpush.msrb.mxu3 %v114_v6  ;;  %219 = vmatpush.msrb.mxu1 %v113_v9 }
  0x1f   :  { %246 = vmatpush.msrb.mxu2 %v113_v9  ;;  %300 = vmatpush.msrb.mxu0 %v113_v9 }
  0x20   :  { %273 = vmatpush.msrb.mxu3 %v113_v9  ;;  %324 = vmatpush.msra.mxu1 %v116_v3 }
  0x21   :  { %357 = vmatmul.msk.f32.gmra.mxu0 %vm81_vm1, %v72_v26 }
  0x22   :  { %325 = vmatpush.msra.mxu1 %v115_v5 }
  0x24   :  { %326 = vmatpush.msra.mxu1 %v114_v6 }
  0x26   :  { %327 = vmatpush.msra.mxu1 %v113_v9 }
  0x93   :  { %v105_v12 = vpop.f32.mrf.mxu0 }
  0x94   :  { %v106_v13 = vadd.f32 %v373_v11, %v105_v12  ;;  %v139_v14 = vpop.f32.mrf.mxu1 }
  0x96   :  { %111 = vst.msk [vmem:[#allocation9] sm:$0xff] %vm81_vm1, %v106_v13 }
  0x9d   :  { %v118_v15 = vld [vmem:[#allocation9] sm:$0x3]  ;;  %v146_v18 = vld [vmem:[#allocation9 + $0x2] sm:$0x3]  ;;  %v173_v22 = vld [vmem:[#allocation9 + $0x4] sm:$0x3] }
  0x9e   :  { %v142_v16 = vadd.f32 %v139_v14, %v118_v15  ;;  %v200_v27 = vld [vmem:[#allocation9 + $0x6] sm:$0x3]  ;;  %v108_v31 = vpop.f32.mrf.mxu0 }
  0x9f   :  { %v109_v32 = vadd.f32 %v373_v11, %v108_v31 }
  0xa0   :  { %374 = vtanh.f32 %v142_v16 }
  0xa1   :  { %112 = vst.msk [vmem:[#allocation9 + $0x8] sm:$0xff] %vm81_vm1, %v109_v32 }
  0xa6   :  { %v375_v17 = vpop.eup %374 }
  0xa7   :  { %145 = vst.msk [vmem:[#allocation9] sm:$0x3] %vm69_vm0, %v375_v17  ;;  %359 = vmatmul.msk.f32.vlgmr.msra.gmra.mxu2 %vm81_vm1, %v375_v17 }
  0xa8   :  { %v227_v33 = vld [vmem:[#allocation9 + $0x8] sm:$0x3]  ;;  %v254_v37 = vld [vmem:[#allocation9 + $0xa] sm:$0x3]  ;;  %v281_v41 = vld [vmem:[#allocation9 + $0xc] sm:$0x3] }
  0xa9   :  { %v308_v45 = vld [vmem:[#allocation9 + $0xe] sm:$0x3] }
 0x12a   :  { %v167_v19 = vpop.f32.mrf.mxu2 }
 0x12b   :  { %v170_v20 = vadd.f32 %v167_v19, %v146_v18 }
 0x12d   :  { %376 = vtanh.f32 %v170_v20 }
 0x133   :  { %v377_v21 = vpop.eup %376 }
 0x134   :  { %172 = vst.msk [vmem:[#allocation9 + $0x2] sm:$0x3] %vm69_vm0, %v377_v21  ;;  %360 = vmatmul.msk.f32.vlgmr.msra.gmra.mxu3 %vm81_vm1, %v377_v21 }
 0x1b7   :  { %v194_v23 = vpop.f32.mrf.mxu3 }
 0x1b8   :  { %v197_v24 = vadd.f32 %v194_v23, %v173_v22 }
 0x1ba   :  { %378 = vtanh.f32 %v197_v24 }
 0x1c0   :  { %v379_v25 = vpop.eup %378 }
 0x1c1   :  { %199 = vst.msk [vmem:[#allocation9 + $0x4] sm:$0x3] %vm69_vm0, %v379_v25  ;;  %361 = vmatmul.msk.f32.vlgmr.msrb.gmra.mxu1 %vm81_vm1, %v379_v25 }
 0x23e   :  { %v221_v28 = vpop.f32.mrf.mxu1 }
 0x23f   :  { %v224_v29 = vadd.f32 %v221_v28, %v200_v27 }
 0x241   :  { %380 = vtanh.f32 %v224_v29 }
 0x247   :  { %v381_v30 = vpop.eup %380 }
 0x248   :  { %226 = vst.msk [vmem:[#allocation9 + $0x6] sm:$0x3] %vm69_vm0, %v381_v30  ;;  %362 = vmatmul.msk.f32.vlgmr.msrb.gmra.mxu2 %vm81_vm1, %v381_v30 }
 0x2cb   :  { %v248_v34 = vpop.f32.mrf.mxu2 }
 0x2cc   :  { %v251_v35 = vadd.f32 %v248_v34, %v227_v33 }
 0x2ce   :  { %382 = vtanh.f32 %v251_v35 }
 0x2d4   :  { %v383_v36 = vpop.eup %382 }
 0x2d5   :  { %253 = vst.msk [vmem:[#allocation9 + $0x8] sm:$0x3] %vm69_vm0, %v383_v36  ;;  %363 = vmatmul.msk.f32.vlgmr.msrb.gmra.mxu3 %vm81_vm1, %v383_v36 }
 0x358   :  { %v275_v38 = vpop.f32.mrf.mxu3 }
 0x359   :  { %v278_v39 = vadd.f32 %v275_v38, %v254_v37 }
 0x35b   :  { %384 = vtanh.f32 %v278_v39 }
 0x361   :  { %v385_v40 = vpop.eup %384 }
 0x362   :  { %280 = vst.msk [vmem:[#allocation9 + $0xa] sm:$0x3] %vm69_vm0, %v385_v40  ;;  %364 = vmatmul.msk.f32.vlgmr.msrb.gmra.mxu0 %vm81_vm1, %v385_v40 }
 0x3df   :  { %v302_v42 = vpop.f32.mrf.mxu0 }
 0x3e0   :  { %v305_v43 = vadd.f32 %v302_v42, %v281_v41 }
 0x3e2   :  { %386 = vtanh.f32 %v305_v43 }
 0x3e8   :  { %v387_v44 = vpop.eup %386 }
 0x3e9   :  { %307 = vst.msk [vmem:[#allocation9 + $0xc] sm:$0x3] %vm69_vm0, %v387_v44  ;;  %365 = vmatmul.msk.f32.vlgmr.msra.gmra.mxu1 %vm81_vm1, %v387_v44 }
 0x466   :  { %v329_v46 = vpop.f32.mrf.mxu1 }
 0x467   :  { %v332_v47 = vadd.f32 %v329_v46, %v308_v45 }
 0x469   :  { %388 = vtanh.f32 %v332_v47 }
 0x46f   :  { %v389_v48 = vpop.eup %388 }
 0x470   :  { %334 = vst.msk [vmem:[#allocation9 + $0xe] sm:$0x3] %vm69_vm0, %v389_v48 }
 0x471   :  { %335 = vst.msk [vmem:[#allocation2] sm:$0x3] %vm69_vm0, %v389_v48  ;;  %348 = dma.vmem_to_hbm [thread:$0]  %s341_s5, 256, %s343_s8, [#allocation5], %s493_s23, %s493_s23, %s494_s24  }
 0x472   :  { %490 = dma.done.wait [#allocation5], 256  }
 0x473   :  { %491 = vsyncadd [#allocation5], 4294967040 }
 0x474   :  { %353 = vsyncpa [#allocation4], 1 }
 0x475   :  { %354 = vsyncpa [#allocation7], 1 }
 0x476   :  { %355 = vsyncpa [#allocation5], 1 }

</bundles_post_ra>
